<compile_context>
chip_gen: v5e
topology: v5e:2x2
jax: 0.10.0
libtpu: 0.0.40
codegen_flags: <defaults>
</compile_context>

<pallas_src>
import jax
import jax.numpy as jnp
from jax import lax
from jax.experimental import pallas as pl
from jax.experimental.pallas import tpu as pltpu

EPS = 1e-5                        # torch.nn.BatchNorm1d default eps
SQRT_2_OVER_PI = 0.7978845608028654
INV_SQRT2 = 0.7071067811865476    # for the exact-erf reference


def prediction_mlp_kernel(x_ref, w1_ref, g1_ref, be1_ref, w2_ref, b2_ref,
                          o_ref):
    """Fused Linear -> BatchNorm1d(train) -> GELU -> Linear.

    Grid axes: (j, k) = (out_dim tile [parallel], hidden tile [reduction]).
    The output block index is constant along k, so o_ref stays VMEM-resident
    for the whole reduction and serves as the f32 accumulator.
    """
    k = pl.program_id(1)

    # ---- Linear 1 (bf16 MXU operands, f32 accumulation), hidden tile k ----
    # Linear-1 bias omitted: it is exactly cancelled by the BN mean subtract.
    h = jnp.dot(x_ref[...].astype(jnp.bfloat16), w1_ref[...],
                preferred_element_type=jnp.float32)

    # ---- BatchNorm1d (training batch stats), folded scale/shift, f32 ------
    inv_n = 1.0 / h.shape[0]
    mean = jnp.sum(h, axis=0, keepdims=True) * inv_n
    var = jnp.sum(h * h, axis=0, keepdims=True) * inv_n - mean * mean
    scale = g1_ref[...] * lax.rsqrt(var + EPS)          # (1, tk)
    shift = be1_ref[...] - mean * scale                 # (1, tk)
    h = h * scale + shift                                # one fused FMA pass

    # ---- GELU (tanh approximation -> EUP slot) -----------------------------
    h = 0.5 * h * (1.0 + jnp.tanh(SQRT_2_OVER_PI *
                                  (h + 0.044715 * h * h * h)))

    # ---- Linear 2: accumulate into the resident f32 output block ----------
    part = jnp.dot(h.astype(jnp.bfloat16), w2_ref[...],
                   preferred_element_type=jnp.float32)

    @pl.when(k == 0)
    def _():
        o_ref[...] = part + b2_ref[...]

    @pl.when(k > 0)
    def _():
        o_ref[...] += part


def prediction_mlp(x, params, *, tile_out=None, tile_hidden=None):
    """Run the fused prediction_MLP kernel.  x: (B, in_dim), f32 or bf16.

    tile_out:    default out_dim (single "parallel" tile; best on 1-TC chips).
                 On v7x pass out_dim // 2 to occupy both TensorCores.
    tile_hidden: contraction tile for the 2nd matmul (reduction grid axis).
    """
    B, in_dim = x.shape
    hidden = params["w1"].shape[1]
    out_dim = params["w2"].shape[1]

    tn = out_dim if tile_out is None else min(tile_out, out_dim)
    tk = min(hidden, 512) if tile_hidden is None else min(tile_hidden, hidden)
    assert out_dim % tn == 0 and hidden % tk == 0
    assert tn == out_dim or tn % 128 == 0
    assert tk == hidden or tk % 128 == 0
    grid = (out_dim // tn, hidden // tk)          # reduction axis (hidden) last

    # Generation-aware VMEM budget from actual resident/tile bytes
    # (resident x + resident out block + double-buffered bf16 weight tiles +
    #  small per-feature vectors), capped at 48 MiB (v7x physical is 64 MiB).
    w_itemsize = jnp.dtype(params["w1"].dtype).itemsize
    need = (B * in_dim * jnp.dtype(x.dtype).itemsize        # resident x
            + 2 * B * tn * 4                                 # output block(s)
            + 2 * (in_dim * tk + tk * tn) * w_itemsize       # w1/w2 dbl-buffer
            + 2 * (2 * tk + tn) * 4)                         # g1/be1/b2
    vmem_limit = int(min(max(2 * need, 16 << 20), 48 << 20))

    grid_spec = pltpu.PrefetchScalarGridSpec(
        num_scalar_prefetch=0,
        grid=grid,
        in_specs=[
            pl.BlockSpec((B, in_dim), lambda j, k: (0, 0)),   # x (resident)
            pl.BlockSpec((in_dim, tk), lambda j, k: (0, k)),  # w1 columns
            pl.BlockSpec((1, tk), lambda j, k: (0, k)),       # gamma1
            pl.BlockSpec((1, tk), lambda j, k: (0, k)),       # beta1
            pl.BlockSpec((tk, tn), lambda j, k: (k, j)),      # w2 tile
            pl.BlockSpec((1, tn), lambda j, k: (0, j)),       # b2
        ],
        out_specs=pl.BlockSpec((B, tn), lambda j, k: (0, j)),
    )

    return pl.pallas_call(
        prediction_mlp_kernel,
        out_shape=jax.ShapeDtypeStruct((B, out_dim), jnp.float32),
        grid_spec=grid_spec,
        compiler_params=pltpu.CompilerParams(
            dimension_semantics=("parallel", "arbitrary"),
            vmem_limit_bytes=vmem_limit),
    )(x, params["w1"], params["g1"], params["be1"],
      params["w2"], params["b2"])


# ------------------------------ reference -----------------------------------

def prediction_mlp_ref(x, p):
    """Pure-JAX reference: exact torch semantics (b1 kept, exact-erf GELU),
    with the same bf16 MXU operands / f32 accumulation."""
    h = jnp.dot(x.astype(jnp.bfloat16), p["w1"],
                preferred_element_type=jnp.float32) + p["b1"]
    inv_n = 1.0 / h.shape[0]
    mean = jnp.sum(h, axis=0, keepdims=True) * inv_n
    var = jnp.sum(h * h, axis=0, keepdims=True) * inv_n - mean * mean
    h = (h - mean) * lax.rsqrt(var + EPS) * p["g1"] + p["be1"]
    h = 0.5 * h * (1.0 + lax.erf(h * INV_SQRT2))
    return jnp.dot(h.astype(jnp.bfloat16), p["w2"],
                   preferred_element_type=jnp.float32) + p["b2"]


# ---------------------------- parameter init --------------------------------

def init_prediction_mlp(key, in_dim=256, hidden_dim=64, out_dim=256):
    k1, k2, k3, k4, k5, k6 = jax.random.split(key, 6)
    # MXU operands (weights) stored bf16; biases / BN affine stay f32.
    return {
        "w1": (jax.random.normal(k1, (in_dim, hidden_dim), jnp.float32)
               * (1.0 / float(in_dim) ** 0.5)).astype(jnp.bfloat16),
        "b1": jax.random.normal(k2, (1, hidden_dim), jnp.float32) * 0.1,
        "g1": 1.0 + jax.random.normal(k3, (1, hidden_dim), jnp.float32) * 0.1,
        "be1": jax.random.normal(k4, (1, hidden_dim), jnp.float32) * 0.1,
        "w2": (jax.random.normal(k5, (hidden_dim, out_dim), jnp.float32)
               * (1.0 / float(hidden_dim) ** 0.5)).astype(jnp.bfloat16),
        "b2": jax.random.normal(k6, (1, out_dim), jnp.float32) * 0.1,
    }


if __name__ == "__main__":
    # Module defaults: in_dim=256, hidden_dim=64, out_dim=256.  Batch is a
    # multiple of 8 (sublane-aligned) and the output is lane-dense (256 wide).
    B, IN_DIM, HIDDEN_DIM, OUT_DIM = 128, 256, 64, 256

    key = jax.random.PRNGKey(0)
    k_x, k_p = jax.random.split(key)
    x = jax.random.normal(k_x, (B, IN_DIM), jnp.float32)
    params = init_prediction_mlp(k_p, IN_DIM, HIDDEN_DIM, OUT_DIM)

    out = prediction_mlp(x, params)
    jax.block_until_ready(out)

    ref = prediction_mlp_ref(x, params)
    assert out.shape == (B, OUT_DIM)
    assert bool(jnp.all(jnp.isfinite(out)))
    # Tolerance covers bf16 matmul rounding, b1-cancellation rounding and the
    # tanh-vs-erf GELU difference (~1e-3).
    assert bool(jnp.allclose(out, ref, atol=2e-2, rtol=2e-2)), \
        float(jnp.max(jnp.abs(out - ref)))
    print("KERNEL_OK")
</pallas_src>

<mosaic_0001>
module attributes {stable_mosaic.version = 11 : i64} {
  func.func @prediction_mlp_kernel(%arg0: i32, %arg1: i32, %arg2: memref<128x256xf32, #tpu.memory_space<vmem>>, %arg3: memref<256x64xbf16, #tpu.memory_space<vmem>>, %arg4: memref<1x64xf32, #tpu.memory_space<vmem>>, %arg5: memref<1x64xf32, #tpu.memory_space<vmem>>, %arg6: memref<64x256xbf16, #tpu.memory_space<vmem>>, %arg7: memref<1x256xf32, #tpu.memory_space<vmem>>, %arg8: memref<128x256xf32, #tpu.memory_space<vmem>>) attributes {dimension_semantics = [#tpu.dimension_semantics<parallel>, #tpu.dimension_semantics<arbitrary>], iteration_bounds = array<i64: 1, 1>, scalar_prefetch = 0 : i64, scratch_operands = 0 : i64, tpu.core_type = #tpu.core_type<tc>, window_params = [{pipeline_mode = #tpu.pipeline_mode<synchronous>, transform_indices = @transform_0, window_bounds = array<i64: 128, 256>}, {transform_indices = @transform_1, window_bounds = array<i64: 256, 64>}, {transform_indices = @transform_2, window_bounds = array<i64: 1, 64>}, {transform_indices = @transform_3, window_bounds = array<i64: 1, 64>}, {transform_indices = @transform_4, window_bounds = array<i64: 64, 256>}, {transform_indices = @transform_5, window_bounds = array<i64: 1, 256>}, {transform_indices = @transform_6, window_bounds = array<i64: 128, 256>}]} {
    %c0 = arith.constant 0 : index
    %c0_0 = arith.constant 0 : index
    %0 = vector.load %arg2[%c0, %c0_0] : memref<128x256xf32, #tpu.memory_space<vmem>>, vector<128x256xf32>
    %1 = arith.truncf %0 : vector<128x256xf32> to vector<128x256xbf16>
    %c0_1 = arith.constant 0 : index
    %c0_2 = arith.constant 0 : index
    %2 = vector.load %arg3[%c0_1, %c0_2] : memref<256x64xbf16, #tpu.memory_space<vmem>>, vector<256x64xbf16>
    %cst = arith.constant dense<0.000000e+00> : vector<128x64xf32>
    %3 = tpu.matmul %1, %2, %cst {dimension_numbers = #tpu.dot_dimension_numbers<[1], [0], [0], [1], [0, 0, 1, 1], [], []>} : vector<128x256xbf16>, vector<256x64xbf16>, vector<128x64xf32> -> vector<128x64xf32>
    %cst_3 = arith.constant dense<0.000000e+00> : vector<64xf32>
    %4 = vector.multi_reduction <add>, %3, %cst_3 [0] : vector<128x64xf32> to vector<64xf32>
    %5 = vector.shape_cast %4 : vector<64xf32> to vector<1x64xf32>
    %cst_4 = arith.constant 7.812500e-03 : f32
    %6 = vector.broadcast %cst_4 : f32 to vector<1x64xf32>
    %7 = arith.mulf %5, %6 : vector<1x64xf32>
    %8 = arith.mulf %3, %3 : vector<128x64xf32>
    %cst_5 = arith.constant dense<0.000000e+00> : vector<64xf32>
    %9 = vector.multi_reduction <add>, %8, %cst_5 [0] : vector<128x64xf32> to vector<64xf32>
    %10 = vector.shape_cast %9 : vector<64xf32> to vector<1x64xf32>
    %cst_6 = arith.constant 7.812500e-03 : f32
    %11 = vector.broadcast %cst_6 : f32 to vector<1x64xf32>
    %12 = arith.mulf %10, %11 : vector<1x64xf32>
    %13 = arith.mulf %7, %7 : vector<1x64xf32>
    %14 = arith.subf %12, %13 : vector<1x64xf32>
    %c0_7 = arith.constant 0 : index
    %c0_8 = arith.constant 0 : index
    %15 = vector.load %arg4[%c0_7, %c0_8] : memref<1x64xf32, #tpu.memory_space<vmem>>, vector<1x64xf32>
    %cst_9 = arith.constant 9.99999974E-6 : f32
    %16 = vector.broadcast %cst_9 : f32 to vector<1x64xf32>
    %17 = arith.addf %14, %16 : vector<1x64xf32>
    %18 = math.rsqrt %17 : vector<1x64xf32>
    %19 = arith.mulf %15, %18 : vector<1x64xf32>
    %c0_10 = arith.constant 0 : index
    %c0_11 = arith.constant 0 : index
    %20 = vector.load %arg5[%c0_10, %c0_11] : memref<1x64xf32, #tpu.memory_space<vmem>>, vector<1x64xf32>
    %21 = arith.mulf %7, %19 : vector<1x64xf32>
    %22 = arith.subf %20, %21 : vector<1x64xf32>
    %23 = vector.broadcast %19 : vector<1x64xf32> to vector<128x64xf32>
    %24 = arith.mulf %3, %23 : vector<128x64xf32>
    %25 = vector.broadcast %22 : vector<1x64xf32> to vector<128x64xf32>
    %26 = arith.addf %24, %25 : vector<128x64xf32>
    %cst_12 = arith.constant 5.000000e-01 : f32
    %27 = vector.broadcast %cst_12 : f32 to vector<128x64xf32>
    %28 = arith.mulf %27, %26 : vector<128x64xf32>
    %cst_13 = arith.constant 4.471500e-02 : f32
    %29 = vector.broadcast %cst_13 : f32 to vector<128x64xf32>
    %30 = arith.mulf %29, %26 : vector<128x64xf32>
    %31 = arith.mulf %30, %26 : vector<128x64xf32>
    %32 = arith.mulf %31, %26 : vector<128x64xf32>
    %33 = arith.addf %26, %32 : vector<128x64xf32>
    %cst_14 = arith.constant 0.797884583 : f32
    %34 = vector.broadcast %cst_14 : f32 to vector<128x64xf32>
    %35 = arith.mulf %34, %33 : vector<128x64xf32>
    %36 = math.tanh %35 : vector<128x64xf32>
    %cst_15 = arith.constant 1.000000e+00 : f32
    %37 = vector.broadcast %cst_15 : f32 to vector<128x64xf32>
    %38 = arith.addf %37, %36 : vector<128x64xf32>
    %39 = arith.mulf %28, %38 : vector<128x64xf32>
    %40 = arith.truncf %39 : vector<128x64xf32> to vector<128x64xbf16>
    %c0_16 = arith.constant 0 : index
    %c0_17 = arith.constant 0 : index
    %41 = vector.load %arg6[%c0_16, %c0_17] : memref<64x256xbf16, #tpu.memory_space<vmem>>, vector<64x256xbf16>
    %cst_18 = arith.constant dense<0.000000e+00> : vector<128x256xf32>
    %42 = tpu.matmul %40, %41, %cst_18 {dimension_numbers = #tpu.dot_dimension_numbers<[1], [0], [0], [1], [0, 0, 1, 1], [], []>} : vector<128x64xbf16>, vector<64x256xbf16>, vector<128x256xf32> -> vector<128x256xf32>
    %c0_i32 = arith.constant 0 : i32
    %43 = arith.cmpi eq, %arg1, %c0_i32 : i32
    %44 = arith.extui %43 : i1 to i32
    %c0_i32_19 = arith.constant 0 : i32
    %45 = arith.cmpi ne, %44, %c0_i32_19 : i32
    scf.if %45 {
      %c0_22 = arith.constant 0 : index
      %c0_23 = arith.constant 0 : index
      %49 = vector.load %arg7[%c0_22, %c0_23] : memref<1x256xf32, #tpu.memory_space<vmem>>, vector<1x256xf32>
      %50 = vector.broadcast %49 : vector<1x256xf32> to vector<128x256xf32>
      %51 = arith.addf %42, %50 : vector<128x256xf32>
      %c0_24 = arith.constant 0 : index
      %c0_25 = arith.constant 0 : index
      %52 = vector.load %arg8[%c0_24, %c0_25] : memref<128x256xf32, #tpu.memory_space<vmem>>, vector<128x256xf32>
      tpu.vector_store %arg8[%c0_24, %c0_25], %51 {strides = array<i32>} : memref<128x256xf32, #tpu.memory_space<vmem>>, vector<128x256xf32>,
    } else {
    }
    %c0_i32_20 = arith.constant 0 : i32
    %46 = arith.cmpi sgt, %arg1, %c0_i32_20 : i32
    %47 = arith.extui %46 : i1 to i32
    %c0_i32_21 = arith.constant 0 : i32
    %48 = arith.cmpi ne, %47, %c0_i32_21 : i32
    scf.if %48 {
      %c0_22 = arith.constant 0 : index
      %c0_23 = arith.constant 0 : index
      %49 = vector.load %arg8[%c0_22, %c0_23] : memref<128x256xf32, #tpu.memory_space<vmem>>, vector<128x256xf32>
      %50 = arith.addf %49, %42 : vector<128x256xf32>
      %c0_24 = arith.constant 0 : index
      %c0_25 = arith.constant 0 : index
      %51 = vector.load %arg8[%c0_24, %c0_25] : memref<128x256xf32, #tpu.memory_space<vmem>>, vector<128x256xf32>
      tpu.vector_store %arg8[%c0_24, %c0_25], %50 {strides = array<i32>} : memref<128x256xf32, #tpu.memory_space<vmem>>, vector<128x256xf32>,
    } else {
    }
    return
  }
  func.func @transform_0(%arg0: i32, %arg1: i32) -> (i32, i32) {
    %c0_i32 = arith.constant 0 : i32
    %c0_i32_0 = arith.constant 0 : i32
    %c0_i32_1 = arith.constant 0 : i32
    return %c0_i32, %c0_i32_0 : i32, i32
  }
  func.func @transform_1(%arg0: i32, %arg1: i32) -> (i32, i32) {
    %c0_i32 = arith.constant 0 : i32
    %c0_i32_0 = arith.constant 0 : i32
    return %c0_i32, %arg1 : i32, i32
  }
  func.func @transform_2(%arg0: i32, %arg1: i32) -> (i32, i32) {
    %c0_i32 = arith.constant 0 : i32
    %c0_i32_0 = arith.constant 0 : i32
    return %c0_i32, %arg1 : i32, i32
  }
  func.func @transform_3(%arg0: i32, %arg1: i32) -> (i32, i32) {
    %c0_i32 = arith.constant 0 : i32
    %c0_i32_0 = arith.constant 0 : i32
    return %c0_i32, %arg1 : i32, i32
  }
  func.func @transform_4(%arg0: i32, %arg1: i32) -> (i32, i32) {
    %c0_i32 = arith.constant 0 : i32
    return %arg1, %arg0 : i32, i32
  }
  func.func @transform_5(%arg0: i32, %arg1: i32) -> (i32, i32) {
    %c0_i32 = arith.constant 0 : i32
    %c0_i32_0 = arith.constant 0 : i32
    return %c0_i32, %arg0 : i32, i32
  }
  func.func @transform_6(%arg0: i32, %arg1: i32) -> (i32, i32) {
    %c0_i32 = arith.constant 0 : i32
    %c0_i32_0 = arith.constant 0 : i32
    return %c0_i32, %arg0 : i32, i32
  }
}

</mosaic_0001>

<bundles_post_ra>
// kernel: tpu_custom_call.1
= control target key start
LH: loop header
LB: loop body
LE: loop exit
PB: predicated region body
PF: predicated region fallthrough
CT: control target
= control target key end

     0   :  { %11 = vsyncpa [#allocation3], 0  ;;  %s1682_s0 = inlined_call_operand.hbm [shape: f32[128,256], index: 0, kind: input, shape index: {}]   ;;  %s1683_s1 = inlined_call_operand.vmem [shape: bf16[256,64], index: 1, kind: input, shape index: {}]   ;;  %s1684_s2 = inlined_call_operand.vmem [shape: f32[1,64], index: 2, kind: input, shape index: {}]   ;;  %s1685_s3 = inlined_call_operand.vmem [shape: f32[1,64], index: 3, kind: input, shape index: {}]   ;;  %s1686_s4 = inlined_call_operand.vmem [shape: bf16[64,256], index: 4, kind: input, shape index: {}]   ;;  %s1687_s5 = inlined_call_operand.vmem [shape: f32[1,256], index: 5, kind: input, shape index: {}]   ;;  %s1688_s6 = inlined_call_operand.hbm [shape: f32[128,256], index: 6, kind: output, shape index: {}]  }
   0x1   :  { %12 = vsyncpa [#allocation4], 0  ;;  %s17_s23 = sshll.u32 %s1682_s0, 4  ;;  %s1205_s24 = smov [#allocation2]   ;;  %s18_s23 = int_to_ptr.hbm [resolvable:$true] %s17_s23 }
   0x2   :  { %s19_s25 = sshll.u32 %s1205_s24, 4  ;;  %s1206_s26 = smov 256   ;;  %s20_s25 = int_to_ptr.vmem [resolvable:$true] %s19_s25 }
   0x3   :  { %s1207_s27 = smov 16  }
   0x4   :  { %25 = dma.hbm_to_vmem [thread:$0]  %s18_s23, 4096, %s20_s25, [#allocation3], %s1206_s26, %s1206_s26, %s1207_s27  }
   0x5   :  { %1201 = dma.done.wait [#allocation3], 4096  }
   0x6   :  { %1202 = vsyncadd [#allocation3], 4294963200  ;;  %v1098_v0 = vld [vmem:[%s1683_s1 + $0x38] sm:$0xff]  ;;  %v1097_v2 = vld [vmem:[%s1683_s1 + $0x30] sm:$0xff]  ;;  %vm315_vm0 = vcmask 523264   ;;  %s966_s25 = sshll.u32 %s1688_s6, 4  ;;  %s967_s25 = int_to_ptr.hbm [resolvable:$true] %s966_s25 }
   0x7   :  { %v1106_v1 = vld [vmem:[%s1683_s1 + $0x78] sm:$0xff]  ;;  %217 = vmatpush.bf16.msra.mxu0 %v1098_v0  ;;  %v1105_v3 = vld [vmem:[%s1683_s1 + $0x70] sm:$0xff]  ;;  %v1096_v4 = vld [vmem:[%s1683_s1 + $0x28] sm:$0xff] }
   0x8   :  { %266 = vmatpush.bf16.msra.mxu1 %v1106_v1  ;;  %v1104_v5 = vld [vmem:[%s1683_s1 + $0x68] sm:$0xff]  ;;  %v1095_v6 = vld [vmem:[%s1683_s1 + $0x20] sm:$0xff]  ;;  %v1094_v8 = vld [vmem:[%s1683_s1 + $0x18] sm:$0xff] }
   0x9   :  { %v1103_v7 = vld [vmem:[%s1683_s1 + $0x60] sm:$0xff]  ;;  %v1102_v9 = vld [vmem:[%s1683_s1 + $0x58] sm:$0xff]  ;;  %v1093_v10 = vld [vmem:[%s1683_s1 + $0x10] sm:$0xff] }
   0xa   :  { %v1101_v11 = vld [vmem:[%s1683_s1 + $0x50] sm:$0xff]  ;;  %v1092_v12 = vld [vmem:[%s1683_s1 + $0x8] sm:$0xff]  ;;  %v1091_v14 = vld [vmem:[%s1683_s1] sm:$0xff] }
   0xb   :  { %218 = vmatpush.bf16.msra.mxu0 %v1097_v2  ;;  %v1100_v13 = vld [vmem:[%s1683_s1 + $0x48] sm:$0xff]  ;;  %v1099_v15 = vld [vmem:[%s1683_s1 + $0x40] sm:$0xff]  ;;  %v43_v17 = vld [vmem:[#allocation2 + $0x10] sm:$0xff] }
   0xc   :  { %267 = vmatpush.bf16.msra.mxu1 %v1105_v3  ;;  %v41_v16 = vld [vmem:[#allocation2] sm:$0xff]  ;;  %v42_v18 = vld [vmem:[#allocation2 + $0x8] sm:$0xff]  ;;  %v44_v19 = vld [vmem:[#allocation2 + $0x18] sm:$0xff] }
   0xd   :  { %v73_v20 = vpack.c.bf16 %v43_v17, %v41_v16  ;;  %v74_v21 = vpack.c.bf16 %v44_v19, %v42_v18  ;;  %v45_v22 = vld [vmem:[#allocation2 + $0x20] sm:$0xff]  ;;  %v47_v23 = vld [vmem:[#allocation2 + $0x30] sm:$0xff]  ;;  %v46_v24 = vld [vmem:[#allocation2 + $0x28] sm:$0xff] }
   0xe   :  { %v48_v25 = vld [vmem:[#allocation2 + $0x38] sm:$0xff]  ;;  %v75_v26 = vpack.c.bf16 %v47_v23, %v45_v22  ;;  %v49_v28 = vld [vmem:[#allocation2 + $0x40] sm:$0xff]  ;;  %v51_v29 = vld [vmem:[#allocation2 + $0x50] sm:$0xff] }
   0xf   :  { %219 = vmatpush.bf16.msra.mxu0 %v1096_v4  ;;  %v76_v27 = vpack.c.bf16 %v48_v25, %v46_v24  ;;  %v50_v30 = vld [vmem:[#allocation2 + $0x48] sm:$0xff]  ;;  %v52_v31 = vld [vmem:[#allocation2 + $0x58] sm:$0xff]  ;;  %v77_v32 = vpack.c.bf16 %v51_v29, %v49_v28  ;;  %v53_v34 = vld [vmem:[#allocation2 + $0x60] sm:$0xff] }
  0x10   :  { %268 = vmatpush.bf16.msra.mxu1 %v1104_v5  ;;  %v78_v33 = vpack.c.bf16 %v52_v31, %v50_v30  ;;  %v55_v35 = vld [vmem:[#allocation2 + $0x70] sm:$0xff]  ;;  %v54_v36 = vld [vmem:[#allocation2 + $0x68] sm:$0xff]  ;;  %v56_v37 = vld [vmem:[#allocation2 + $0x78] sm:$0xff] }
  0x11   :  { %v79_v38 = vpack.c.bf16 %v55_v35, %v53_v34  ;;  %v80_v39 = vpack.c.bf16 %v56_v37, %v54_v36  ;;  %v57_v40 = vld [vmem:[#allocation2 + $0x80] sm:$0xff]  ;;  %v59_v41 = vld [vmem:[#allocation2 + $0x90] sm:$0xff]  ;;  %v58_v42 = vld [vmem:[#allocation2 + $0x88] sm:$0xff] }
  0x12   :  { %v60_v43 = vld [vmem:[#allocation2 + $0x98] sm:$0xff]  ;;  %v81_v44 = vpack.c.bf16 %v59_v41, %v57_v40  ;;  %v61_v46 = vld [vmem:[#allocation2 + $0xa0] sm:$0xff]  ;;  %v63_v47 = vld [vmem:[#allocation2 + $0xb0] sm:$0xff] }
  0x13   :  { %220 = vmatpush.bf16.msra.mxu0 %v1095_v6  ;;  %v82_v45 = vpack.c.bf16 %v60_v43, %v58_v42  ;;  %v62_v48 = vld [vmem:[#allocation2 + $0xa8] sm:$0xff]  ;;  %v64_v49 = vld [vmem:[#allocation2 + $0xb8] sm:$0xff]  ;;  %v83_v50 = vpack.c.bf16 %v63_v47, %v61_v46  ;;  %v65_v52 = vld [vmem:[#allocation2 + $0xc0] sm:$0xff] }
  0x14   :  { %269 = vmatpush.bf16.msra.mxu1 %v1103_v7  ;;  %v84_v51 = vpack.c.bf16 %v64_v49, %v62_v48  ;;  %v67_v53 = vld [vmem:[#allocation2 + $0xd0] sm:$0xff]  ;;  %v66_v54 = vld [vmem:[#allocation2 + $0xc8] sm:$0xff]  ;;  %v68_v55 = vld [vmem:[#allocation2 + $0xd8] sm:$0xff] }
  0x15   :  { %v85_v56 = vpack.c.bf16 %v67_v53, %v65_v52  ;;  %v86_v57 = vpack.c.bf16 %v68_v55, %v66_v54  ;;  %v69_v58 = vld [vmem:[#allocation2 + $0xe0] sm:$0xff]  ;;  %v71_v59 = vld [vmem:[#allocation2 + $0xf0] sm:$0xff]  ;;  %v70_v60 = vld [vmem:[#allocation2 + $0xe8] sm:$0xff] }
  0x16   :  { %v72_v61 = vld [vmem:[#allocation2 + $0xf8] sm:$0xff]  ;;  %v87_v62 = vpack.c.bf16 %v71_v59, %v69_v58 }
  0x17   :  { %221 = vmatpush.bf16.msra.mxu0 %v1094_v8  ;;  %v88_v63 = vpack.c.bf16 %v72_v61, %v70_v60 }
  0x18   :  { %270 = vmatpush.bf16.msra.mxu1 %v1102_v9 }
  0x1b   :  { %222 = vmatpush.bf16.msra.mxu0 %v1093_v10 }
  0x1c   :  { %271 = vmatpush.bf16.msra.mxu1 %v1101_v11 }
  0x1f   :  { %223 = vmatpush.bf16.msra.mxu0 %v1092_v12 }
  0x20   :  { %272 = vmatpush.bf16.msra.mxu1 %v1100_v13 }
  0x23   :  { %224 = vmatpush.bf16.msra.mxu0 %v1091_v14 }
  0x24   :  { %273 = vmatpush.bf16.msra.mxu1 %v1099_v15 }
  0x26   :  { %225 = vmatmul.bf16.vlgmr.msra.gmra.mxu0 %v73_v20 }
  0x27   :  { %274 = vmatmul.bf16.vlgmr.msra.gmra.mxu1 %v74_v21 }
  0x36   :  { %230 = vmatmul.bf16.gmra.mxu0 %v75_v26 }
  0x37   :  { %279 = vmatmul.bf16.gmra.mxu1 %v76_v27 }
  0x46   :  { %235 = vmatmul.bf16.gmra.mxu0 %v77_v32 }
  0x47   :  { %284 = vmatmul.bf16.gmra.mxu1 %v78_v33 }
  0x56   :  { %240 = vmatmul.bf16.gmra.mxu0 %v79_v38 }
  0x57   :  { %289 = vmatmul.bf16.gmra.mxu1 %v80_v39 }
  0x66   :  { %245 = vmatmul.bf16.gmra.mxu0 %v81_v44 }
  0x67   :  { %294 = vmatmul.bf16.gmra.mxu1 %v82_v45 }
  0x76   :  { %250 = vmatmul.bf16.gmra.mxu0 %v83_v50 }
  0x77   :  { %299 = vmatmul.bf16.gmra.mxu1 %v84_v51 }
  0x86   :  { %255 = vmatmul.bf16.gmra.mxu0 %v85_v56 }
  0x87   :  { %304 = vmatmul.bf16.gmra.mxu1 %v86_v57 }
  0x96   :  { %260 = vmatmul.bf16.gmra.mxu0 %v87_v62 }
  0x97   :  { %309 = vmatmul.bf16.gmra.mxu1 %v88_v63 }
  0xa3   :  { %v226_v0 = vpop.f32.mrf.mxu0 }
  0xa4   :  { %v275_v1 = vpop.f32.mrf.mxu1 }
  0xa5   :  { %v1298_v2 = vadd.f32 %v275_v1, %v226_v0 }
  0xa7   :  { %v354_v30 = vmul.f32 %v1298_v2, %v1298_v2  ;;  %v316_v33 = vsel %vm315_vm0, %v1298_v2, 0.0 }
  0xa9   :  { %v370_v38 = vsel %vm315_vm0, %v354_v30, 0.0 }
  0xab   :  { %v228_v3 = vpop.f32.mrf.mxu0 }
  0xac   :  { %v277_v4 = vpop.f32.mrf.mxu1 }
  0xad   :  { %v1300_v5 = vadd.f32 %v277_v4, %v228_v3 }
  0xaf   :  { %v355_v29 = vmul.f32 %v1300_v5, %v1300_v5  ;;  %v317_v31 = vsel %vm315_vm0, %v1300_v5, 0.0 }
  0xb0   :  { %v318_v39 = vadd.f32 %v317_v31, %v316_v33 }
  0xb1   :  { %v371_v34 = vsel %vm315_vm0, %v355_v29, 0.0 }
  0xb2   :  { %v372_v46 = vadd.f32 %v371_v34, %v370_v38 }
  0xb3   :  { %v231_v6 = vpop.f32.mrf.mxu0 }
  0xb4   :  { %v280_v7 = vpop.f32.mrf.mxu1 }
  0xb5   :  { %v1302_v8 = vadd.f32 %v280_v7, %v231_v6 }
  0xb7   :  { %v356_v32 = vmul.f32 %v1302_v8, %v1302_v8  ;;  %v319_v35 = vsel %vm315_vm0, %v1302_v8, 0.0 }
  0xb8   :  { %v320_v47 = vadd.f32 %v319_v35, %v318_v39 }
  0xb9   :  { %v373_v42 = vsel %vm315_vm0, %v356_v32, 0.0 }
  0xba   :  { %v374_v52 = vadd.f32 %v373_v42, %v372_v46 }
  0xbb   :  { %v233_v9 = vpop.f32.mrf.mxu0 }
  0xbc   :  { %v282_v10 = vpop.f32.mrf.mxu1 }
  0xbd   :  { %v1304_v11 = vadd.f32 %v282_v10, %v233_v9 }
  0xbf   :  { %v357_v36 = vmul.f32 %v1304_v11, %v1304_v11  ;;  %v321_v43 = vsel %vm315_vm0, %v1304_v11, 0.0 }
  0xc0   :  { %v322_v53 = vadd.f32 %v321_v43, %v320_v47 }
  0xc1   :  { %v375_v48 = vsel %vm315_vm0, %v357_v36, 0.0 }
  0xc2   :  { %v376_v58 = vadd.f32 %v375_v48, %v374_v52 }
  0xc3   :  { %v236_v12 = vpop.f32.mrf.mxu0 }
  0xc4   :  { %v285_v13 = vpop.f32.mrf.mxu1 }
  0xc5   :  { %v1306_v14 = vadd.f32 %v285_v13, %v236_v12 }
  0xc7   :  { %v358_v44 = vmul.f32 %v1306_v14, %v1306_v14  ;;  %v323_v49 = vsel %vm315_vm0, %v1306_v14, 0.0 }
  0xc8   :  { %v324_v59 = vadd.f32 %v323_v49, %v322_v53 }
  0xc9   :  { %v377_v54 = vsel %vm315_vm0, %v358_v44, 0.0 }
  0xca   :  { %v378_v0 = vadd.f32 %v377_v54, %v376_v58 }
  0xcb   :  { %v238_v15 = vpop.f32.mrf.mxu0 }
  0xcc   :  { %v287_v16 = vpop.f32.mrf.mxu1 }
  0xcd   :  { %v1323_v37 = vadd.f32 %v287_v16, %v238_v15 }
  0xcf   :  { %v359_v50 = vmul.f32 %v1323_v37, %v1323_v37  ;;  %v325_v55 = vsel %vm315_vm0, %v1323_v37, 0.0 }
  0xd0   :  { %v326_v1 = vadd.f32 %v325_v55, %v324_v59 }
  0xd1   :  { %v379_v60 = vsel %vm315_vm0, %v359_v50, 0.0 }
  0xd2   :  { %v380_v12 = vadd.f32 %v379_v60, %v378_v0 }
  0xd3   :  { %v241_v17 = vpop.f32.mrf.mxu0 }
  0xd4   :  { %v290_v18 = vpop.f32.mrf.mxu1 }
  0xd5   :  { %v1331_v45 = vadd.f32 %v290_v18, %v241_v17 }
  0xd7   :  { %v360_v56 = vmul.f32 %v1331_v45, %v1331_v45  ;;  %v327_v61 = vsel %vm315_vm0, %v1331_v45, 0.0 }
  0xd8   :  { %v328_v13 = vadd.f32 %v327_v61, %v326_v1 }
  0xd9   :  { %v381_v6 = vsel %vm315_vm0, %v360_v56, 0.0 }
  0xdb   :  { %v243_v19 = vpop.f32.mrf.mxu0 }
  0xdc   :  { %v292_v20 = vpop.f32.mrf.mxu1 }
  0xdd   :  { %v1338_v51 = vadd.f32 %v292_v20, %v243_v19  ;;  %v382_v19 = vadd.f32 %v381_v6, %v380_v12 }
  0xdf   :  { %v361_v62 = vmul.f32 %v1338_v51, %v1338_v51  ;;  %v329_v7 = vsel %vm315_vm0, %v1338_v51, 0.0 }
  0xe0   :  { %v330_v20 = vadd.f32 %v329_v7, %v328_v13 }
  0xe1   :  { %v383_v15 = vsel %vm315_vm0, %v361_v62, 0.0 }
  0xe3   :  { %v246_v21 = vpop.f32.mrf.mxu0 }
  0xe4   :  { %v295_v22 = vpop.f32.mrf.mxu1 }
  0xe5   :  { %v1345_v57 = vadd.f32 %v295_v22, %v246_v21 }
  0xe7   :  { %v362_v9 = vmul.f32 %v1345_v57, %v1345_v57  ;;  %v331_v16 = vsel %vm315_vm0, %v1345_v57, 0.0 }
  0xe9   :  { %v385_v21 = vsel %vm315_vm0, %v362_v9, 0.0 }
  0xeb   :  { %v248_v23 = vpop.f32.mrf.mxu0 }
  0xec   :  { %v297_v24 = vpop.f32.mrf.mxu1 }
  0xed   :  { %v1352_v63 = vadd.f32 %v297_v24, %v248_v23 }
  0xef   :  { %v363_v17 = vmul.f32 %v1352_v63, %v1352_v63  ;;  %v333_v22 = vsel %vm315_vm0, %v1352_v63, 0.0 }
  0xf1   :  { %v387_v29 = vsel %vm315_vm0, %v363_v17, 0.0 }
  0xf3   :  { %v251_v25 = vpop.f32.mrf.mxu0 }
  0xf4   :  { %v300_v26 = vpop.f32.mrf.mxu1 }
  0xf5   :  { %v1359_v10 = vadd.f32 %v300_v26, %v251_v25  ;;  %v384_v25 = vadd.f32 %v383_v15, %v382_v19  ;;  %v332_v26 = vadd.f32 %v331_v16, %v330_v20 }
  0xf7   :  { %v364_v23 = vmul.f32 %v1359_v10, %v1359_v10  ;;  %v386_v31 = vadd.f32 %v385_v21, %v384_v25  ;;  %v334_v32 = vadd.f32 %v333_v22, %v332_v26 }
  0xf9   :  { %v389_v35 = vsel %vm315_vm0, %v364_v23, 0.0 }
  0xfb   :  { %v253_v27 = vpop.f32.mrf.mxu0 }
  0xfc   :  { %v302_v28 = vpop.f32.mrf.mxu1 }
  0xfd   :  { %v1366_v18 = vadd.f32 %v302_v28, %v253_v27  ;;  %v335_v27 = vsel %vm315_vm0, %v1359_v10, 0.0 }
  0xff   :  { %v365_v28 = vmul.f32 %v1366_v18, %v1366_v18  ;;  %v337_v36 = vsel %vm315_vm0, %v1366_v18, 0.0 }
 0x101   :  { %v391_v42 = vsel %vm315_vm0, %v365_v28, 0.0 }
 0x103   :  { %v256_v40 = vpop.f32.mrf.mxu0 }
 0x104   :  { %v305_v41 = vpop.f32.mrf.mxu1 }
 0x105   :  { %v1373_v24 = vadd.f32 %v305_v41, %v256_v40  ;;  %v388_v40 = vadd.f32 %v387_v29, %v386_v31  ;;  %v336_v41 = vadd.f32 %v335_v27, %v334_v32  ;;  %v1069_v32 = vld [vmem:[%s1686_s4 + $0x30] sm:$0xf] }
 0x107   :  { %v366_v38 = vmul.f32 %v1373_v24, %v1373_v24  ;;  %v339_v43 = vsel %vm315_vm0, %v1373_v24, 0.0  ;;  %v390_v46 = vadd.f32 %v389_v35, %v388_v40  ;;  %v338_v47 = vadd.f32 %v337_v36, %v336_v41  ;;  %v1113_v35 = vld [vmem:[%s1686_s4 + $0x34] sm:$0xf]  ;;  %v1071_v36 = vld [vmem:[%s1686_s4 + $0x38] sm:$0xf0] }
 0x108   :  { %v1074_v41 = vor.u32 %v1113_v35, %v1071_v36 }
 0x109   :  { %v393_v48 = vsel %vm315_vm0, %v366_v38, 0.0  ;;  %v392_v52 = vadd.f32 %v391_v42, %v390_v46  ;;  %v340_v53 = vadd.f32 %v339_v43, %v338_v47  ;;  %v1061_v38 = vld [vmem:[%s1686_s4 + $0x20] sm:$0xf]  ;;  %v1112_v42 = vld [vmem:[%s1686_s4 + $0x24] sm:$0xf0] }
 0x10a   :  { %v1111_v43 = vld [vmem:[%s1686_s4 + $0x24] sm:$0xf]  ;;  %v1062_v46 = vor.u32 %v1112_v42, %v1061_v38  ;;  %741 = vmatpush.bf16.msra.mxu3 %v1074_v41 }
 0x10b   :  { %v258_v3 = vpop.f32.mrf.mxu0  ;;  %v394_v56 = vadd.f32 %v393_v48, %v392_v52  ;;  %v1109_v52 = vld [vmem:[%s1686_s4 + $0x14] sm:$0xf] }
 0x10c   :  { %v307_v4 = vpop.f32.mrf.mxu1 }
 0x10d   :  { %v1380_v30 = vadd.f32 %v307_v4, %v258_v3 }
 0x10f   :  { %v367_v44 = vmul.f32 %v1380_v30, %v1380_v30  ;;  %v341_v49 = vsel %vm315_vm0, %v1380_v30, 0.0 }
 0x110   :  { %v342_v58 = vadd.f32 %v341_v49, %v340_v53  ;;  %v1053_v49 = vld [vmem:[%s1686_s4 + $0x10] sm:$0xf]  ;;  %v1055_v53 = vld [vmem:[%s1686_s4 + $0x18] sm:$0xf0] }
 0x111   :  { %v395_v54 = vsel %vm315_vm0, %v367_v44, 0.0  ;;  %v1063_v44 = vld [vmem:[%s1686_s4 + $0x28] sm:$0xf0] }
 0x112   :  { %v396_v0 = vadd.f32 %v395_v54, %v394_v56  ;;  %v1066_v48 = vor.u32 %v1111_v43, %v1063_v44  ;;  %v1045_v56 = vld [vmem:[%s1686_s4] sm:$0xf] }
 0x113   :  { %v261_v33 = vpop.f32.mrf.mxu0 }
 0x114   :  { %v310_v34 = vpop.f32.mrf.mxu1  ;;  %742 = vmatpush.bf16.msra.mxu3 %v1066_v48 }
 0x115   :  { %v1387_v39 = vadd.f32 %v310_v34, %v261_v33  ;;  %v1114_v33 = vld [vmem:[%s1686_s4 + $0x34] sm:$0xf0] }
 0x116   :  { %v1070_v34 = vor.u32 %v1114_v33, %v1069_v32 }
 0x117   :  { %v368_v50 = vmul.f32 %v1387_v39, %v1387_v39  ;;  %v343_v55 = vsel %vm315_vm0, %v1387_v39, 0.0 }
 0x118   :  { %v344_v1 = vadd.f32 %v343_v55, %v342_v58  ;;  %692 = vmatpush.bf16.msra.mxu2 %v1070_v34  ;;  %v1058_v55 = vor.u32 %v1109_v52, %v1055_v53  ;;  %v1108_v58 = vld [vmem:[%s1686_s4 + $0x4] sm:$0xf0] }
 0x119   :  { %v397_v61 = vsel %vm315_vm0, %v368_v50, 0.0  ;;  %v1110_v50 = vld [vmem:[%s1686_s4 + $0x14] sm:$0xf0] }
 0x11a   :  { %v398_v6 = vadd.f32 %v397_v61, %v396_v0  ;;  %v1054_v54 = vor.u32 %v1110_v50, %v1053_v49  ;;  %v1046_v61 = vor.u32 %v1108_v58, %v1045_v56  ;;  %743 = vmatpush.bf16.msra.mxu3 %v1058_v55 }
 0x11b   :  { %v263_v59 = vpop.f32.mrf.mxu0 }
 0x11c   :  { %v312_v60 = vpop.f32.mrf.mxu1  ;;  %693 = vmatpush.bf16.msra.mxu2 %v1062_v46 }
 0x11d   :  { %v1403_v62 = vadd.f32 %v312_v60, %v263_v59  ;;  %v1107_v59 = vld [vmem:[%s1686_s4 + $0x4] sm:$0xf]  ;;  %v1047_v60 = vld [vmem:[%s1686_s4 + $0x8] sm:$0xf0] }
 0x11f   :  { %v345_v3 = vsel %vm315_vm0, %v1403_v62, 0.0  ;;  %v369_v4 = vmul.f32 %v1403_v62, %v1403_v62 }
 0x120   :  { %v346_v7 = vadd.f32 %v345_v3, %v344_v1  ;;  %694 = vmatpush.bf16.msra.mxu2 %v1054_v54  ;;  %v1050_v1 = vor.u32 %v1107_v59, %v1047_v60 }
 0x121   :  { %v399_v9 = vsel %vm315_vm0, %v369_v4, 0.0 }
 0x122   :  { %v347_v12 = vrot.slane %v346_v7, 4  ;;  %v400_v13 = vadd.f32 %v399_v9, %v398_v6  ;;  %744 = vmatpush.bf16.msra.mxu3 %v1050_v1  ;;  %v410_v9 = vld [vmem:[%s1684_s2] sm:$0x1] }
 0x124   :  { %v348_v15 = vadd.f32 %v347_v12, %v346_v7  ;;  %v401_v16 = vrot.slane %v400_v13, 4  ;;  %695 = vmatpush.bf16.msra.mxu2 %v1046_v61 }
 0x126   :  { %v349_v17 = vrot.slane %v348_v15, 2  ;;  %v402_v19 = vadd.f32 %v401_v16, %v400_v13  ;;  %v423_v16 = vld [vmem:[%s1685_s3] sm:$0x1] }
 0x128   :  { %v350_v20 = vadd.f32 %v349_v17, %v348_v15  ;;  %v403_v21 = vrot.slane %v402_v19, 2 }
 0x12a   :  { %v351_v22 = vrot.slane %v350_v20, 1  ;;  %v404_v23 = vadd.f32 %v403_v21, %v402_v19 }
 0x12c   :  { %v352_v25 = vadd.f32 %v351_v22, %v350_v20  ;;  %v405_v26 = vrot.slane %v404_v23, 1 }
 0x12e   :  { %v353_v29 = vmul.f32 0.0078125, %v352_v25  ;;  %v406_v27 = vadd.f32 %v405_v26, %v404_v23 }
 0x130   :  { %v407_v28 = vmul.f32 0.0078125, %v406_v27  ;;  %v408_v31 = vmul.f32 %v353_v29, %v353_v29 }
 0x132   :  { %v409_v40 = vsub.f32 %v407_v28, %v408_v31 }
 0x134   :  { %v411_v47 = vadd.f32 1e-05, %v409_v40 }
 0x136   :  { %1119 = vrsqrt.f32 %v411_v47  ;;  %vm418_vm2 = vweird.f32 %v411_v47 }
 0x13c   :  { %v1120_v0 = vpop.eup %1119 }
 0x13d   :  { %v413_v3 = vmul.f32 %v1120_v0, %v411_v47  ;;  %vm419_vm1 = vweird.f32 %v1120_v0 }
 0x13e   :  { %vm420_vm3 = vmor %vm418_vm2, %vm419_vm1 }
 0x13f   :  { %v414_v4 = vmul.f32 %v1120_v0, %v413_v3 }
 0x141   :  { %v415_v6 = vmul.f32 0.5, %v414_v4 }
 0x143   :  { %v416_v7 = vsub.f32 1.5, %v415_v6 }
 0x145   :  { %v417_v12 = vmul.f32 %v1120_v0, %v416_v7 }
 0x147   :  { %v421_v13 = vsel %vm420_vm3, %v1120_v0, %v417_v12 }
 0x148   :  { %v422_v15 = vmul.f32 %v421_v13, %v410_v9 }
 0x14a   :  { %v424_v17 = vmul.f32 %v422_v15, %v353_v29  ;;  %v1464_v19 = vperm.slane %v422_v15, 0 }
 0x14c   :  { %v425_v20 = vsub.f32 %v423_v16, %v424_v17  ;;  %v444_v21 = vmul.f32 %v1464_v19, %v1403_v62  ;;  %v429_v23 = vmul.f32 %v1464_v19, %v1298_v2  ;;  %v430_v25 = vmul.f32 %v1464_v19, %v1300_v5 }
 0x14d   :  { %v431_v26 = vmul.f32 %v1464_v19, %v1302_v8  ;;  %v432_v29 = vmul.f32 %v1464_v19, %v1304_v11  ;;  %v433_v40 = vmul.f32 %v1464_v19, %v1306_v14  ;;  %v434_v42 = vmul.f32 %v1464_v19, %v1323_v37 }
 0x14e   :  { %v1468_v22 = vperm.slane %v425_v20, 0  ;;  %v437_v14 = vmul.f32 %v1464_v19, %v1345_v57  ;;  %v438_v37 = vmul.f32 %v1464_v19, %v1352_v63  ;;  %v435_v57 = vmul.f32 %v1464_v19, %v1331_v45 }
 0x14f   :  { %v436_v63 = vmul.f32 %v1464_v19, %v1338_v51  ;;  %v439_v59 = vmul.f32 %v1464_v19, %v1359_v10  ;;  %v440_v1 = vmul.f32 %v1464_v19, %v1366_v18 }
 0x150   :  { %v1479_v27 = vadd.f32 %v1468_v22, %v444_v21  ;;  %v448_v28 = vadd.f32 %v1468_v22, %v429_v23  ;;  %v449_v62 = vadd.f32 %v1468_v22, %v430_v25  ;;  %v1484_v31 = vadd.f32 %v1468_v22, %v431_v26 }
 0x151   :  { %v1487_v2 = vadd.f32 %v1468_v22, %v432_v29  ;;  %v1498_v46 = vadd.f32 %v1468_v22, %v433_v40  ;;  %v1501_v47 = vadd.f32 %v1468_v22, %v434_v42  ;;  %v1511_v54 = vadd.f32 %v1468_v22, %v437_v14 }
 0x152   :  { %v480_v5 = vmul.f32 0.044715, %v448_v28  ;;  %v481_v32 = vmul.f32 0.044715, %v449_v62  ;;  %v482_v8 = vmul.f32 0.044715, %v1484_v31  ;;  %v1515_v56 = vadd.f32 %v1468_v22, %v438_v37 }
 0x153   :  { %v483_v33 = vmul.f32 0.044715, %v1487_v2  ;;  %v484_v53 = vmul.f32 0.044715, %v1498_v46  ;;  %v485_v55 = vmul.f32 0.044715, %v1501_v47  ;;  %v1531_v45 = vadd.f32 %v1468_v22, %v435_v57 }
 0x154   :  { %v496_v11 = vmul.f32 %v480_v5, %v448_v28  ;;  %v497_v34 = vmul.f32 %v481_v32, %v449_v62  ;;  %v498_v38 = vmul.f32 %v482_v8, %v1484_v31  ;;  %v488_v61 = vmul.f32 0.044715, %v1511_v54 }
 0x155   :  { %v499_v41 = vmul.f32 %v483_v33, %v1487_v2  ;;  %v489_v0 = vmul.f32 0.044715, %v1515_v56  ;;  %v464_v3 = vmul.f32 0.5, %v448_v28  ;;  %v500_v4 = vmul.f32 %v484_v53, %v1498_v46 }
 0x156   :  { %v512_v35 = vmul.f32 %v496_v11, %v448_v28  ;;  %v513_v36 = vmul.f32 %v497_v34, %v449_v62  ;;  %v514_v50 = vmul.f32 %v498_v38, %v1484_v31  ;;  %v1534_v51 = vadd.f32 %v1468_v22, %v439_v59 }
 0x157   :  { %v515_v52 = vmul.f32 %v499_v41, %v1487_v2  ;;  %v501_v10 = vmul.f32 %v485_v55, %v1501_v47  ;;  %v504_v6 = vmul.f32 %v488_v61, %v1511_v54  ;;  %v505_v7 = vmul.f32 %v489_v0, %v1515_v56 }
 0x158   :  { %v528_v43 = vadd.f32 %v512_v35, %v448_v28  ;;  %v529_v44 = vadd.f32 %v513_v36, %v449_v62  ;;  %v530_v58 = vadd.f32 %v514_v50, %v1484_v31  ;;  %v1540_v9 = vadd.f32 %v1468_v22, %v440_v1 }
 0x159   :  { %v531_v60 = vadd.f32 %v515_v52, %v1487_v2  ;;  %v465_v18 = vmul.f32 0.5, %v449_v62  ;;  %v1543_v15 = vadd.f32 %v1468_v22, %v436_v63  ;;  %v490_v16 = vmul.f32 0.044715, %v1534_v51 }
 0x15a   :  { %v544_v48 = vmul.f32 0.7978846, %v528_v43  ;;  %v545_v49 = vmul.f32 0.7978846, %v529_v44  ;;  %v546_v13 = vmul.f32 0.7978846, %v530_v58  ;;  %v520_v23 = vmul.f32 %v504_v6, %v1511_v54 }
 0x15b   :  { %v547_v21 = vmul.f32 0.7978846, %v531_v60  ;;  %v521_v25 = vmul.f32 %v505_v7, %v1515_v56  ;;  %v516_v29 = vmul.f32 %v500_v4, %v1498_v46  ;;  %v491_v28 = vmul.f32 0.044715, %v1540_v9 }
 0x15c   :  { %1121 = vtanh.f32 %v544_v48  ;;  %v506_v62 = vmul.f32 %v490_v16, %v1534_v51  ;;  %v517_v32 = vmul.f32 %v501_v10, %v1501_v47  ;;  %v536_v8 = vadd.f32 %v520_v23, %v1511_v54 }
 0x15d   :  { %1123 = vtanh.f32 %v545_v49  ;;  %v537_v33 = vadd.f32 %v521_v25, %v1515_v56  ;;  %v507_v34 = vmul.f32 %v491_v28, %v1540_v9  ;;  %v486_v36 = vmul.f32 0.044715, %v1531_v45 }
 0x15e   :  { %1125 = vtanh.f32 %v546_v13  ;;  %v522_v35 = vmul.f32 %v506_v62, %v1534_v51  ;;  %v552_v38 = vmul.f32 0.7978846, %v536_v8  ;;  %v487_v42 = vmul.f32 0.044715, %v1543_v15 }
 0x15f   :  { %1127 = vtanh.f32 %v547_v21  ;;  %v553_v40 = vmul.f32 0.7978846, %v537_v33  ;;  %v523_v43 = vmul.f32 %v507_v34, %v1540_v9  ;;  %v532_v44 = vadd.f32 %v516_v29, %v1498_v46 }
 0x160   :  { %v533_v48 = vadd.f32 %v517_v32, %v1501_v47  ;;  %1129 = vtanh.f32 %v552_v38  ;;  %v538_v49 = vadd.f32 %v522_v35, %v1534_v51  ;;  %v466_v50 = vmul.f32 0.5, %v1484_v31 }
 0x161   :  { %1131 = vtanh.f32 %v553_v40  ;;  %v539_v14 = vadd.f32 %v523_v43, %v1540_v9  ;;  %v441_v52 = vmul.f32 %v1464_v19, %v1373_v24  ;;  %v467_v37 = vmul.f32 0.5, %v1487_v2 }
 0x162   :  { %v1122_v12 = vpop.eup %1121  ;;  %v1570_v53 = vmul.f32 %v486_v36, %v1531_v45  ;;  %v554_v55 = vmul.f32 0.7978846, %v538_v49  ;;  %v442_v58 = vmul.f32 %v1464_v19, %v1380_v30  ;;  %v503_v63 = vmul.f32 %v487_v42, %v1543_v15 }
 0x163   :  { %v1124_v17 = vpop.eup %1123  ;;  %v576_v20 = vadd.f32 1.0, %v1122_v12  ;;  %v555_v59 = vmul.f32 0.7978846, %v539_v14  ;;  %v1576_v31 = vadd.f32 %v1468_v22, %v441_v52  ;;  %v443_v60 = vmul.f32 %v1464_v19, %v1387_v39 }
 0x164   :  { %v577_v26 = vadd.f32 1.0, %v1124_v17  ;;  %v1126_v57 = vpop.eup %1125  ;;  %v548_v61 = vmul.f32 0.7978846, %v532_v44  ;;  %v549_v2 = vmul.f32 0.7978846, %v533_v48  ;;  %1133 = vtanh.f32 %v554_v55 }
 0x165   :  { %v592_v5 = vmul.f32 %v576_v20, %v464_v3  ;;  %v1128_v24 = vpop.eup %1127  ;;  %v1581_v0 = vadd.f32 %v1468_v22, %v442_v58  ;;  %v472_v1 = vmul.f32 0.5, %v1511_v54  ;;  %1135 = vtanh.f32 %v555_v59 }
 0x166   :  { %v593_v11 = vmul.f32 %v577_v26, %v465_v18  ;;  %v492_v30 = vmul.f32 0.044715, %v1576_v31  ;;  %v1586_v3 = vadd.f32 %v1468_v22, %v443_v60  ;;  %v1130_v4 = vpop.eup %1129  ;;  %v578_v10 = vadd.f32 1.0, %v1126_v57 }
 0x167   :  { %v473_v6 = vmul.f32 0.5, %v1515_v56  ;;  %v493_v39 = vmul.f32 0.044715, %v1581_v0  ;;  %v495_v19 = vmul.f32 0.044715, %v1479_v27  ;;  %v1132_v7 = vpop.eup %1131  ;;  %v579_v12 = vadd.f32 1.0, %v1128_v24 }
 0x168   :  { %v608_v41 = vpack.c.bf16 %v593_v11, %v592_v5  ;;  %v584_v18 = vadd.f32 1.0, %v1130_v4  ;;  %v508_v13 = vmul.f32 %v492_v30, %v1576_v31  ;;  %v494_v54 = vmul.f32 0.044715, %v1586_v3 }
 0x169   :  { %v585_v16 = vadd.f32 1.0, %v1132_v7  ;;  %v474_v17 = vmul.f32 0.5, %v1534_v51  ;;  %v509_v22 = vmul.f32 %v493_v39, %v1581_v0  ;;  %v511_v20 = vmul.f32 %v495_v19, %v1479_v27 }
 0x16a   :  { %1075 = vmatmul.msk.bf16.vlgmr.msra.gmra.mxu2 %vm315_vm0, %v608_v41  ;;  %1083 = vmatmul.msk.bf16.vlgmr.msra.gmra.mxu3 %vm315_vm0, %v608_v41  ;;  %v600_v21 = vmul.f32 %v584_v18, %v472_v1  ;;  %v475_v56 = vmul.f32 0.5, %v1540_v9  ;;  %v524_v23 = vmul.f32 %v508_v13, %v1576_v31  ;;  %v510_v25 = vmul.f32 %v494_v54, %v1586_v3  ;;  %v1134_v26 = vpop.eup %1133 }
 0x16b   :  { %v594_v29 = vmul.f32 %v578_v10, %v466_v50  ;;  %v601_v28 = vmul.f32 %v585_v16, %v473_v6  ;;  %v525_v62 = vmul.f32 %v509_v22, %v1581_v0  ;;  %v527_v5 = vmul.f32 %v511_v20, %v1479_v27  ;;  %v1136_v32 = vpop.eup %1135 }
 0x16c   :  { %v595_v51 = vmul.f32 %v579_v12, %v467_v37  ;;  %v586_v8 = vadd.f32 1.0, %v1134_v26  ;;  %v540_v33 = vadd.f32 %v524_v23, %v1576_v31  ;;  %v526_v11 = vmul.f32 %v510_v25, %v1586_v3 }
 0x16d   :  { %v1603_v34 = vpack.c.bf16 %v601_v28, %v600_v21  ;;  %v587_v9 = vadd.f32 1.0, %v1136_v32  ;;  %v541_v35 = vadd.f32 %v525_v62, %v1581_v0  ;;  %v543_v36 = vadd.f32 %v527_v5, %v1479_v27 }
 0x16e   :  { %1137 = vtanh.f32 %v548_v61  ;;  %v602_v38 = vmul.f32 %v586_v8, %v474_v17  ;;  %v556_v40 = vmul.f32 0.7978846, %v540_v33  ;;  %v542_v41 = vadd.f32 %v526_v11, %v1586_v3 }
 0x16f   :  { %1139 = vtanh.f32 %v549_v2  ;;  %v603_v42 = vmul.f32 %v587_v9, %v475_v56  ;;  %v557_v43 = vmul.f32 0.7978846, %v541_v35  ;;  %v559_v44 = vmul.f32 0.7978846, %v543_v36 }
 0x170   :  { %v609_v48 = vpack.c.bf16 %v595_v51, %v594_v29  ;;  %1141 = vtanh.f32 %v556_v40  ;;  %v558_v49 = vmul.f32 0.7978846, %v542_v41  ;;  %v518_v14 = vmul.f32 %v1570_v53, %v1531_v45 }
 0x171   :  { %v613_v50 = vpack.c.bf16 %v603_v42, %v602_v38  ;;  %1143 = vtanh.f32 %v557_v43  ;;  %v519_v52 = vmul.f32 %v503_v63, %v1543_v15  ;;  %v468_v60 = vmul.f32 0.5, %v1498_v46 }
 0x172   :  { %1145 = vtanh.f32 %v558_v49  ;;  %v534_v57 = vadd.f32 %v518_v14, %v1531_v45  ;;  %v476_v61 = vmul.f32 0.5, %v1576_v31  ;;  %v477_v4 = vmul.f32 0.5, %v1581_v0 }
 0x173   :  { %1147 = vtanh.f32 %v559_v44  ;;  %v535_v24 = vadd.f32 %v519_v52, %v1543_v15  ;;  %v469_v6 = vmul.f32 0.5, %v1501_v47  ;;  %v478_v19 = vmul.f32 0.5, %v1586_v3 }
 0x174   :  { %v1138_v37 = vpop.eup %1137  ;;  %v550_v12 = vmul.f32 0.7978846, %v534_v57  ;;  %v479_v18 = vmul.f32 0.5, %v1479_v27  ;;  %v470_v27 = vmul.f32 0.5, %v1531_v45  ;;  %v471_v25 = vmul.f32 0.5, %v1543_v15 }
 0x175   :  { %v1140_v55 = vpop.eup %1139  ;;  %v580_v30 = vadd.f32 1.0, %v1138_v37  ;;  %v551_v31 = vmul.f32 0.7978846, %v535_v24  ;;  %v790_v45 = vld [vmem:[%s1687_s5] sm:$0x3]  ;;  %s1208_s5 = smov [#allocation5]  }
 0x176   :  { %v1142_v58 = vpop.eup %1141  ;;  %v581_v53 = vadd.f32 1.0, %v1140_v55  ;;  %1149 = vtanh.f32 %v550_v12  ;;  %v1640_v15 = vperm.slane %v790_v45, 0  ;;  %v1642_v62 = vperm.slane %v790_v45, 1  ;;  %s964_s22 = sshll.u32 %s1208_s5, 4  ;;  %s965_s22 = int_to_ptr.vmem [resolvable:$true] %s964_s22 }
 0x177   :  { %v1144_v59 = vpop.eup %1143  ;;  %v588_v2 = vadd.f32 1.0, %v1142_v58  ;;  %v596_v16 = vmul.f32 %v580_v30, %v468_v60  ;;  %1151 = vtanh.f32 %v551_v31 }
 0x178   :  { %v1146_v1 = vpop.eup %1145  ;;  %v589_v63 = vadd.f32 1.0, %v1144_v59  ;;  %v597_v17 = vmul.f32 %v581_v53, %v469_v6 }
 0x179   :  { %v1148_v10 = vpop.eup %1147  ;;  %v604_v39 = vmul.f32 %v588_v2, %v476_v61  ;;  %v590_v7 = vadd.f32 1.0, %v1146_v1 }
 0x17a   :  { %1076 = vmatmul.msk.bf16.gmra.mxu2 %vm315_vm0, %v609_v48  ;;  %1084 = vmatmul.msk.bf16.gmra.mxu3 %vm315_vm0, %v609_v48  ;;  %v605_v46 = vmul.f32 %v589_v63, %v477_v4  ;;  %v591_v13 = vadd.f32 1.0, %v1148_v10  ;;  %v610_v21 = vpack.c.bf16 %v597_v17, %v596_v16 }
 0x17b   :  { %v606_v54 = vmul.f32 %v590_v7, %v478_v19 }
 0x17c   :  { %v614_v22 = vpack.c.bf16 %v605_v46, %v604_v39  ;;  %v607_v20 = vmul.f32 %v591_v13, %v479_v18  ;;  %v1150_v47 = vpop.eup %1149 }
 0x17d   :  { %v1152_v3 = vpop.eup %1151  ;;  %v582_v56 = vadd.f32 1.0, %v1150_v47 }
 0x17e   :  { %v615_v0 = vpack.c.bf16 %v607_v20, %v606_v54  ;;  %v583_v23 = vadd.f32 1.0, %v1152_v3 }
 0x17f   :  { %v598_v26 = vmul.f32 %v582_v56, %v470_v27 }
 0x180   :  { %v599_v29 = vmul.f32 %v583_v23, %v471_v25 }
 0x182   :  { %v611_v28 = vpack.c.bf16 %v599_v29, %v598_v26 }
 0x18a   :  { %1077 = vmatmul.msk.bf16.gmra.mxu2 %vm315_vm0, %v610_v21  ;;  %1085 = vmatmul.msk.bf16.gmra.mxu3 %vm315_vm0, %v610_v21 }
 0x19a   :  { %1078 = vmatmul.msk.bf16.gmra.mxu2 %vm315_vm0, %v611_v28  ;;  %1086 = vmatmul.msk.bf16.gmra.mxu3 %vm315_vm0, %v611_v28 }
 0x1aa   :  { %1079 = vmatmul.msk.bf16.gmra.mxu2 %vm315_vm0, %v1603_v34  ;;  %1087 = vmatmul.msk.bf16.gmra.mxu3 %vm315_vm0, %v1603_v34 }
 0x1ba   :  { %1080 = vmatmul.msk.bf16.gmra.mxu2 %vm315_vm0, %v613_v50  ;;  %1088 = vmatmul.msk.bf16.gmra.mxu3 %vm315_vm0, %v613_v50 }
 0x1ca   :  { %1081 = vmatmul.msk.bf16.gmra.mxu2 %vm315_vm0, %v614_v22  ;;  %1089 = vmatmul.msk.bf16.gmra.mxu3 %vm315_vm0, %v614_v22 }
 0x1da   :  { %1082 = vmatmul.msk.bf16.gmra.mxu2 %vm315_vm0, %v615_v0  ;;  %1090 = vmatmul.msk.bf16.gmra.mxu3 %vm315_vm0, %v615_v0 }
 0x1ed   :  { %v697_v5 = vpop.f32.mrf.mxu2  ;;  %v746_v32 = vpop.f32.mrf.mxu3 }
 0x1ee   :  { %v796_v51 = vadd.f32 %v1640_v15, %v697_v5  ;;  %v797_v8 = vadd.f32 %v1642_v62, %v746_v32 }
 0x1f0   :  { %828 = vst [vmem:[#allocation5] sm:$0xff] %v796_v51 }
 0x1f1   :  { %829 = vst [vmem:[#allocation5 + $0x8] sm:$0xff] %v797_v8 }
 0x1f5   :  { %v699_v33 = vpop.f32.mrf.mxu2  ;;  %v748_v11 = vpop.f32.mrf.mxu3 }
 0x1f6   :  { %v798_v34 = vadd.f32 %v1640_v15, %v699_v33  ;;  %v799_v9 = vadd.f32 %v1642_v62, %v748_v11 }
 0x1f8   :  { %830 = vst [vmem:[#allocation5 + $0x10] sm:$0xff] %v798_v34 }
 0x1f9   :  { %831 = vst [vmem:[#allocation5 + $0x18] sm:$0xff] %v799_v9 }
 0x1fd   :  { %v702_v35 = vpop.f32.mrf.mxu2  ;;  %v751_v36 = vpop.f32.mrf.mxu3 }
 0x1fe   :  { %v800_v38 = vadd.f32 %v1640_v15, %v702_v35  ;;  %v801_v40 = vadd.f32 %v1642_v62, %v751_v36 }
 0x200   :  { %832 = vst [vmem:[#allocation5 + $0x20] sm:$0xff] %v800_v38 }
 0x201   :  { %833 = vst [vmem:[#allocation5 + $0x28] sm:$0xff] %v801_v40 }
 0x205   :  { %v704_v41 = vpop.f32.mrf.mxu2  ;;  %v753_v42 = vpop.f32.mrf.mxu3 }
 0x206   :  { %v802_v43 = vadd.f32 %v1640_v15, %v704_v41  ;;  %v803_v44 = vadd.f32 %v1642_v62, %v753_v42 }
 0x208   :  { %834 = vst [vmem:[#allocation5 + $0x30] sm:$0xff] %v802_v43 }
 0x209   :  { %835 = vst [vmem:[#allocation5 + $0x38] sm:$0xff] %v803_v44 }
 0x20d   :  { %v707_v48 = vpop.f32.mrf.mxu2  ;;  %v756_v49 = vpop.f32.mrf.mxu3 }
 0x20e   :  { %v804_v50 = vadd.f32 %v1640_v15, %v707_v48  ;;  %v805_v14 = vadd.f32 %v1642_v62, %v756_v49 }
 0x210   :  { %836 = vst [vmem:[#allocation5 + $0x40] sm:$0xff] %v804_v50 }
 0x211   :  { %837 = vst [vmem:[#allocation5 + $0x48] sm:$0xff] %v805_v14 }
 0x215   :  { %v709_v52 = vpop.f32.mrf.mxu2  ;;  %v758_v37 = vpop.f32.mrf.mxu3 }
 0x216   :  { %v806_v55 = vadd.f32 %v1640_v15, %v709_v52  ;;  %v807_v58 = vadd.f32 %v1642_v62, %v758_v37 }
 0x218   :  { %838 = vst [vmem:[#allocation5 + $0x50] sm:$0xff] %v806_v55 }
 0x219   :  { %839 = vst [vmem:[#allocation5 + $0x58] sm:$0xff] %v807_v58 }
 0x21d   :  { %v712_v57 = vpop.f32.mrf.mxu2  ;;  %v761_v59 = vpop.f32.mrf.mxu3 }
 0x21e   :  { %v808_v60 = vadd.f32 %v1640_v15, %v712_v57  ;;  %v809_v24 = vadd.f32 %v1642_v62, %v761_v59 }
 0x220   :  { %840 = vst [vmem:[#allocation5 + $0x60] sm:$0xff] %v808_v60 }
 0x221   :  { %841 = vst [vmem:[#allocation5 + $0x68] sm:$0xff] %v809_v24 }
 0x225   :  { %v714_v61 = vpop.f32.mrf.mxu2  ;;  %v763_v2 = vpop.f32.mrf.mxu3 }
 0x226   :  { %v810_v1 = vadd.f32 %v1640_v15, %v714_v61  ;;  %v811_v30 = vadd.f32 %v1642_v62, %v763_v2 }
 0x228   :  { %842 = vst [vmem:[#allocation5 + $0x70] sm:$0xff] %v810_v1 }
 0x229   :  { %843 = vst [vmem:[#allocation5 + $0x78] sm:$0xff] %v811_v30 }
 0x22d   :  { %v717_v53 = vpop.f32.mrf.mxu2  ;;  %v766_v4 = vpop.f32.mrf.mxu3 }
 0x22e   :  { %v812_v63 = vadd.f32 %v1640_v15, %v717_v53  ;;  %v813_v10 = vadd.f32 %v1642_v62, %v766_v4 }
 0x230   :  { %844 = vst [vmem:[#allocation5 + $0x80] sm:$0xff] %v812_v63 }
 0x231   :  { %845 = vst [vmem:[#allocation5 + $0x88] sm:$0xff] %v813_v10 }
 0x235   :  { %v719_v6 = vpop.f32.mrf.mxu2  ;;  %v768_v39 = vpop.f32.mrf.mxu3 }
 0x236   :  { %v814_v19 = vadd.f32 %v1640_v15, %v719_v6  ;;  %v815_v7 = vadd.f32 %v1642_v62, %v768_v39 }
 0x238   :  { %846 = vst [vmem:[#allocation5 + $0x90] sm:$0xff] %v814_v19 }
 0x239   :  { %847 = vst [vmem:[#allocation5 + $0x98] sm:$0xff] %v815_v7 }
 0x23d   :  { %v722_v12 = vpop.f32.mrf.mxu2  ;;  %v771_v46 = vpop.f32.mrf.mxu3 }
 0x23e   :  { %v816_v18 = vadd.f32 %v1640_v15, %v722_v12  ;;  %v817_v13 = vadd.f32 %v1642_v62, %v771_v46 }
 0x240   :  { %848 = vst [vmem:[#allocation5 + $0xa0] sm:$0xff] %v816_v18 }
 0x241   :  { %849 = vst [vmem:[#allocation5 + $0xa8] sm:$0xff] %v817_v13 }
 0x245   :  { %v724_v31 = vpop.f32.mrf.mxu2  ;;  %v773_v54 = vpop.f32.mrf.mxu3 }
 0x246   :  { %v818_v16 = vadd.f32 %v1640_v15, %v724_v31  ;;  %v819_v17 = vadd.f32 %v1642_v62, %v773_v54 }
 0x248   :  { %850 = vst [vmem:[#allocation5 + $0xb0] sm:$0xff] %v818_v16 }
 0x249   :  { %851 = vst [vmem:[#allocation5 + $0xb8] sm:$0xff] %v819_v17 }
 0x24d   :  { %v727_v22 = vpop.f32.mrf.mxu2  ;;  %v776_v20 = vpop.f32.mrf.mxu3 }
 0x24e   :  { %v820_v0 = vadd.f32 %v1640_v15, %v727_v22  ;;  %v821_v21 = vadd.f32 %v1642_v62, %v776_v20 }
 0x250   :  { %852 = vst [vmem:[#allocation5 + $0xc0] sm:$0xff] %v820_v0 }
 0x251   :  { %853 = vst [vmem:[#allocation5 + $0xc8] sm:$0xff] %v821_v21 }
 0x255   :  { %v729_v47 = vpop.f32.mrf.mxu2  ;;  %v778_v3 = vpop.f32.mrf.mxu3 }
 0x256   :  { %v822_v56 = vadd.f32 %v1640_v15, %v729_v47  ;;  %v823_v23 = vadd.f32 %v1642_v62, %v778_v3 }
 0x258   :  { %854 = vst [vmem:[#allocation5 + $0xd0] sm:$0xff] %v822_v56 }
 0x259   :  { %855 = vst [vmem:[#allocation5 + $0xd8] sm:$0xff] %v823_v23 }
 0x25d   :  { %v732_v27 = vpop.f32.mrf.mxu2  ;;  %v781_v25 = vpop.f32.mrf.mxu3 }
 0x25e   :  { %v824_v26 = vadd.f32 %v1640_v15, %v732_v27  ;;  %v825_v29 = vadd.f32 %v1642_v62, %v781_v25 }
 0x260   :  { %856 = vst [vmem:[#allocation5 + $0xe0] sm:$0xff] %v824_v26 }
 0x261   :  { %857 = vst [vmem:[#allocation5 + $0xe8] sm:$0xff] %v825_v29 }
 0x265   :  { %v734_v28 = vpop.f32.mrf.mxu2  ;;  %v783_v45 = vpop.f32.mrf.mxu3 }
 0x266   :  { %v826_v5 = vadd.f32 %v1640_v15, %v734_v28  ;;  %v827_v32 = vadd.f32 %v1642_v62, %v783_v45 }
 0x268   :  { %858 = vst [vmem:[#allocation5 + $0xf0] sm:$0xff] %v826_v5 }
 0x269   :  { %859 = vst [vmem:[#allocation5 + $0xf8] sm:$0xff] %v827_v32 }
 0x26a   :  { %972 = dma.vmem_to_hbm [thread:$0]  %s965_s22, 4096, %s967_s25, [#allocation4], %s1206_s26, %s1206_s26, %s1207_s27  }
 0x26b   :  { %1203 = dma.done.wait [#allocation4], 4096  }
 0x26c   :  { %1204 = vsyncadd [#allocation4], 4294963200 }
 0x26d   :  { %977 = vsyncpa [#allocation3], 1 }
 0x26e   :  { %978 = vsyncpa [#allocation4], 1 }

</bundles_post_ra>
